<compile_context>
chip_gen: v5e
topology: v5e:2x2
jax: 0.10.0
libtpu: 0.0.40
codegen_flags: <defaults>
</compile_context>

<pallas_src>
import functools

import jax
import jax.numpy as jnp
from jax import lax
from jax.experimental import pallas as pl
from jax.experimental.pallas import tpu as pltpu


A_DIM = 76
S_DIM = 152
HIDDEN = 30
H_PAD = 128            # hidden padded to full lane width
ONE_LANE = HIDDEN      # spare hidden lane carrying a constant 1 (folds bo into the dot)
W_ROWS = 240           # bf16 weight slab rows: [0,152)=Ws, [152,228)=Wa, rest zero
TAIL_ROWS = 8          # f32 tail slab rows: row 0 = fused bias (+1 at ONE_LANE), row 1 = w_out (+bo)
MAX_TB = 1024          # max batch-tile rows (VMEM stays tiny even double-buffered)


def _round_up(x, m):
    return ((x + m - 1) // m) * m


def critic_kernel(s_ref, a_ref, w_ref, t_ref, out_ref, *, s_dim, a_dim):
    """s_ref: (TB, s_dim) f32; a_ref: (TB, a_dim) f32;
    w_ref: (W_ROWS, H_PAD) bf16 packed [Ws; Wa]; t_ref: (TAIL_ROWS, H_PAD) f32;
    out_ref: (1, 1, TB) f32 lane-dense Q row."""
    # Upcast the bf16 weight slab once; all arithmetic below is f32 (v5e-safe).
    w = w_ref[...].astype(jnp.float32)
    w_s = w[:s_dim, :]                            # (s_dim, H_PAD)
    w_a = w[s_dim:s_dim + a_dim, :]               # (a_dim, H_PAD)
    b_in = t_ref[0:1, :]                          # fused bias (bs + ba), 1.0 at ONE_LANE
    w_out = t_ref[1:2, :]                         # output weight row, bo at ONE_LANE

    # Fused input layer: two MXU dots (f32 accumulation) + bias + ReLU.
    # Padded hidden lanes stay 0; lane ONE_LANE becomes exactly 1.0.
    h = jnp.maximum(
        jnp.dot(s_ref[...], w_s, preferred_element_type=jnp.float32)
        + jnp.dot(a_ref[...], w_a, preferred_element_type=jnp.float32)
        + b_in,
        0.0)                                      # (TB, H_PAD)

    # hidden -> 1 projection as a skinny MXU matmul producing a lane-dense row;
    # the output bias rides along via the constant-1 hidden lane.
    q_row = lax.dot_general(w_out, h, (((1,), (1,)), ((), ())),
                            preferred_element_type=jnp.float32)   # (1, TB)
    out_ref[0] = q_row.astype(out_ref.dtype)


def _choose_tiling(batch):
    if batch < 512:
        n_tiles = 1                               # tiny batch: single step, no pipeline overhead
    else:
        # >= 2 grid steps so ("parallel",) shards across both v7x TensorCores;
        # tiles capped at MAX_TB rows, sized to minimize padded rows.
        n_tiles = max(2, pl.cdiv(batch, MAX_TB))
    block_b = _round_up(pl.cdiv(batch, n_tiles), 8)
    return n_tiles, block_b


def critic_forward(s, a, w_slab, tail):
    """Pallas forward of CriticNet. Returns (B, 1) f32 Q-values."""
    batch, s_dim = s.shape
    a_dim = a.shape[1]
    n_tiles, block_b = _choose_tiling(batch)
    b_pad = n_tiles * block_b
    if b_pad != batch:                            # minimal batch padding only when needed
        s = jnp.pad(s, ((0, b_pad - batch), (0, 0)))
        a = jnp.pad(a, ((0, b_pad - batch), (0, 0)))

    out = pl.pallas_call(
        functools.partial(critic_kernel, s_dim=s_dim, a_dim=a_dim),
        out_shape=jax.ShapeDtypeStruct((n_tiles, 1, block_b), jnp.float32),
        grid=(n_tiles,),
        in_specs=[
            pl.BlockSpec((block_b, s_dim), lambda i: (i, 0)),      # state rows
            pl.BlockSpec((block_b, a_dim), lambda i: (i, 0)),      # action rows
            pl.BlockSpec((W_ROWS, H_PAD), lambda i: (0, 0)),       # bf16 weight slab
            pl.BlockSpec((TAIL_ROWS, H_PAD), lambda i: (0, 0)),    # f32 bias/w_out tail
        ],
        out_specs=pl.BlockSpec((1, 1, block_b), lambda i: (i, 0, 0)),
        compiler_params=pltpu.CompilerParams(
            dimension_semantics=("parallel",)),
    )(s, a, w_slab, tail)

    # (n_tiles, 1, block_b) -> (b_pad,) -> (B, 1).  Padded rows hold garbage Q
    # (relu(b_in)·wo + bo), so this [:batch] slice must stay.
    return out.reshape(b_pad)[:batch, None]


def init_params(key, s_dim, a_dim, hidden=HIDDEN):
    """Matches the PyTorch module's init: weights ~ N(0, 0.1); biases use
    PyTorch's default Linear bias init U(-1/sqrt(fan_in), 1/sqrt(fan_in)).
    Weights are stored transposed: (in_features, out_features)."""
    ks = jax.random.split(key, 6)
    ws = 0.1 * jax.random.normal(ks[0], (s_dim, hidden), jnp.float32)
    wa = 0.1 * jax.random.normal(ks[1], (a_dim, hidden), jnp.float32)
    wo = 0.1 * jax.random.normal(ks[2], (hidden, 1), jnp.float32)
    bs = jax.random.uniform(ks[3], (hidden,), jnp.float32,
                            -1.0 / jnp.sqrt(s_dim), 1.0 / jnp.sqrt(s_dim))
    ba = jax.random.uniform(ks[4], (hidden,), jnp.float32,
                            -1.0 / jnp.sqrt(a_dim), 1.0 / jnp.sqrt(a_dim))
    bo = jax.random.uniform(ks[5], (1,), jnp.float32,
                            -1.0 / jnp.sqrt(hidden), 1.0 / jnp.sqrt(hidden))
    return ws, bs, wa, ba, wo, bo


def pack_params(params, w_rows=W_ROWS, h_pad=H_PAD):
    """Pack weights into one zero-padded bf16 slab (w_rows, h_pad) and the
    biases / output row into a small f32 tail slab (TAIL_ROWS, h_pad)."""
    ws, bs, wa, ba, wo, bo = params
    s_dim, hidden = ws.shape
    a_dim = wa.shape[0]
    assert s_dim + a_dim <= w_rows and hidden < h_pad

    w_slab = jnp.zeros((w_rows, h_pad), jnp.float32)
    w_slab = w_slab.at[:s_dim, :hidden].set(ws)
    w_slab = w_slab.at[s_dim:s_dim + a_dim, :hidden].set(wa)
    w_slab = w_slab.astype(jnp.bfloat16)          # halves the param DMA

    tail = jnp.zeros((TAIL_ROWS, h_pad), jnp.float32)
    tail = tail.at[0, :hidden].set(bs + ba)       # fused input bias
    tail = tail.at[0, ONE_LANE].set(1.0)          # constant-1 lane -> carries bo
    tail = tail.at[1, :hidden].set(wo[:, 0])      # output weight row
    tail = tail.at[1, ONE_LANE].set(bo[0])        # output bias via the 1-lane
    return w_slab, tail


def reference_forward(s, a, params, *, weight_dtype=jnp.bfloat16):
    """Pure-JAX reference. First-layer weights are rounded through the kernel's
    bf16 storage dtype so the comparison isolates kernel correctness."""
    ws, bs, wa, ba, wo, bo = params
    ws = ws.astype(weight_dtype).astype(jnp.float32)
    wa = wa.astype(weight_dtype).astype(jnp.float32)
    x = s @ ws + bs
    y = a @ wa + ba
    return jnp.maximum(x + y, 0.0) @ wo + bo


if __name__ == "__main__":
    key = jax.random.PRNGKey(0)
    k_p, k_s, k_a, k_s2, k_a2 = jax.random.split(key, 5)

    params = init_params(k_p, S_DIM, A_DIM)
    w_slab, tail = pack_params(params)

    # Small batch (single grid step).
    batch = 8
    s = jax.random.normal(k_s, (batch, S_DIM), jnp.float32)
    a = jax.random.normal(k_a, (batch, A_DIM), jnp.float32)
    q = jax.block_until_ready(critic_forward(s, a, w_slab, tail))
    q_ref = reference_forward(s, a, params)
    assert q.shape == (batch, 1)
    assert jnp.allclose(q, q_ref, atol=1e-4, rtol=1e-4), "mismatch vs reference (B=8)"

    # Larger batch exercises the 2-tile "parallel" grid + remainder padding.
    big = 1000
    s2 = jax.random.normal(k_s2, (big, S_DIM), jnp.float32)
    a2 = jax.random.normal(k_a2, (big, A_DIM), jnp.float32)
    q2 = jax.block_until_ready(critic_forward(s2, a2, w_slab, tail))
    q2_ref = reference_forward(s2, a2, params)
    assert q2.shape == (big, 1)
    assert jnp.allclose(q2, q2_ref, atol=1e-4, rtol=1e-4), "mismatch vs reference (B=1000)"

    print("KERNEL_OK")
</pallas_src>

<mosaic_0001>
module attributes {stable_mosaic.version = 11 : i64} {
  func.func @critic_kernel(%arg0: i32, %arg1: memref<8x152xf32, #tpu.memory_space<vmem>>, %arg2: memref<8x76xf32, #tpu.memory_space<vmem>>, %arg3: memref<240x128xbf16, #tpu.memory_space<vmem>>, %arg4: memref<8x128xf32, #tpu.memory_space<vmem>>, %arg5: memref<1x1x8xf32, #tpu.memory_space<vmem>>) attributes {dimension_semantics = [#tpu.dimension_semantics<parallel>], iteration_bounds = array<i64: 1>, scalar_prefetch = 0 : i64, scratch_operands = 0 : i64, tpu.core_type = #tpu.core_type<tc>, window_params = [{transform_indices = @transform_0, window_bounds = array<i64: 8, 152>}, {transform_indices = @transform_1, window_bounds = array<i64: 8, 76>}, {pipeline_mode = #tpu.pipeline_mode<synchronous>, transform_indices = @transform_2, window_bounds = array<i64: 240, 128>}, {pipeline_mode = #tpu.pipeline_mode<synchronous>, transform_indices = @transform_3, window_bounds = array<i64: 8, 128>}, {transform_indices = @transform_4, window_bounds = array<i64: 1, 1, 8>}]} {
    %c0 = arith.constant 0 : index
    %c0_0 = arith.constant 0 : index
    %0 = vector.load %arg3[%c0, %c0_0] : memref<240x128xbf16, #tpu.memory_space<vmem>>, vector<240x128xbf16>
    %1 = arith.extf %0 : vector<240x128xbf16> to vector<240x128xf32>
    %2 = vector.extract_strided_slice %1 {offsets = [0, 0], sizes = [152, 128], strides = [1, 1]} : vector<240x128xf32> to vector<152x128xf32>
    %3 = vector.extract_strided_slice %1 {offsets = [152, 0], sizes = [76, 128], strides = [1, 1]} : vector<240x128xf32> to vector<76x128xf32>
    %c0_1 = arith.constant 0 : index
    %c0_2 = arith.constant 0 : index
    %4 = vector.load %arg4[%c0_1, %c0_2] : memref<8x128xf32, #tpu.memory_space<vmem>>, vector<1x128xf32>
    %c1 = arith.constant 1 : index
    %c0_3 = arith.constant 0 : index
    %5 = vector.load %arg4[%c1, %c0_3] : memref<8x128xf32, #tpu.memory_space<vmem>>, vector<1x128xf32>
    %c0_4 = arith.constant 0 : index
    %c0_5 = arith.constant 0 : index
    %6 = vector.load %arg1[%c0_4, %c0_5] : memref<8x152xf32, #tpu.memory_space<vmem>>, vector<8x152xf32>
    %cst = arith.constant dense<0.000000e+00> : vector<8x128xf32>
    %7 = tpu.matmul %6, %2, %cst {dimension_numbers = #tpu.dot_dimension_numbers<[1], [0], [0], [1], [0, 0, 1, 1], [], []>} : vector<8x152xf32>, vector<152x128xf32>, vector<8x128xf32> -> vector<8x128xf32>
    %c0_6 = arith.constant 0 : index
    %c0_7 = arith.constant 0 : index
    %8 = vector.load %arg2[%c0_6, %c0_7] : memref<8x76xf32, #tpu.memory_space<vmem>>, vector<8x76xf32>
    %cst_8 = arith.constant dense<0.000000e+00> : vector<8x128xf32>
    %9 = tpu.matmul %8, %3, %cst_8 {dimension_numbers = #tpu.dot_dimension_numbers<[1], [0], [0], [1], [0, 0, 1, 1], [], []>} : vector<8x76xf32>, vector<76x128xf32>, vector<8x128xf32> -> vector<8x128xf32>
    %10 = arith.addf %7, %9 : vector<8x128xf32>
    %11 = vector.broadcast %4 : vector<1x128xf32> to vector<8x128xf32>
    %12 = arith.addf %10, %11 : vector<8x128xf32>
    %cst_9 = arith.constant 0.000000e+00 : f32
    %13 = vector.broadcast %cst_9 : f32 to vector<8x128xf32>
    %14 = arith.maximumf %12, %13 : vector<8x128xf32>
    %cst_10 = arith.constant dense<0.000000e+00> : vector<1x8xf32>
    %15 = tpu.matmul %5, %14, %cst_10 {dimension_numbers = #tpu.dot_dimension_numbers<[1], [1], [0], [0], [0, 0, 1, 0], [], []>} : vector<1x128xf32>, vector<8x128xf32>, vector<1x8xf32> -> vector<1x8xf32>
    %c0_11 = arith.constant 0 : index
    %c0_12 = arith.constant 0 : index
    %c0_13 = arith.constant 0 : index
    %16 = vector.load %arg5[%c0_11, %c0_12, %c0_13] : memref<1x1x8xf32, #tpu.memory_space<vmem>>, vector<1x1x8xf32>
    %17 = vector.shape_cast %16 : vector<1x1x8xf32> to vector<1x8xf32>
    %18 = vector.shape_cast %15 : vector<1x8xf32> to vector<1x1x8xf32>
    tpu.vector_store %arg5[%c0_11, %c0_12, %c0_13], %18 {strides = array<i32>} : memref<1x1x8xf32, #tpu.memory_space<vmem>>, vector<1x1x8xf32>,
    return
  }
  func.func @transform_0(%arg0: i32) -> (i32, i32) {
    %c0_i32 = arith.constant 0 : i32
    %c0_i32_0 = arith.constant 0 : i32
    return %arg0, %c0_i32 : i32, i32
  }
  func.func @transform_1(%arg0: i32) -> (i32, i32) {
    %c0_i32 = arith.constant 0 : i32
    %c0_i32_0 = arith.constant 0 : i32
    return %arg0, %c0_i32 : i32, i32
  }
  func.func @transform_2(%arg0: i32) -> (i32, i32) {
    %c0_i32 = arith.constant 0 : i32
    %c0_i32_0 = arith.constant 0 : i32
    %c0_i32_1 = arith.constant 0 : i32
    return %c0_i32, %c0_i32_0 : i32, i32
  }
  func.func @transform_3(%arg0: i32) -> (i32, i32) {
    %c0_i32 = arith.constant 0 : i32
    %c0_i32_0 = arith.constant 0 : i32
    %c0_i32_1 = arith.constant 0 : i32
    return %c0_i32, %c0_i32_0 : i32, i32
  }
  func.func @transform_4(%arg0: i32) -> (i32, i32, i32) {
    %c0_i32 = arith.constant 0 : i32
    %c0_i32_0 = arith.constant 0 : i32
    %c0_i32_1 = arith.constant 0 : i32
    return %arg0, %c0_i32, %c0_i32_0 : i32, i32, i32
  }
}

</mosaic_0001>

<bundles_post_ra>
// kernel: tpu_custom_call.1
= control target key start
LH: loop header
LB: loop body
LE: loop exit
PB: predicated region body
PF: predicated region fallthrough
CT: control target
= control target key end

     0   :  { %9 = vsyncpa [#allocation3], 0  ;;  %s509_s0 = inlined_call_operand.hbm [shape: f32[8,152], index: 0, kind: input, shape index: {}]   ;;  %s510_s1 = inlined_call_operand.hbm [shape: f32[8,76], index: 1, kind: input, shape index: {}]   ;;  %s511_s2 = inlined_call_operand.hbm [shape: bf16[240,128], index: 2, kind: input, shape index: {}]   ;;  %s512_s3 = inlined_call_operand.hbm [shape: f32[8,128], index: 3, kind: input, shape index: {}]   ;;  %s513_s4 = inlined_call_operand.hbm [shape: f32[1,1,8], index: 4, kind: output, shape index: {}]  }
   0x1   :  { %10 = vsyncpa [#allocation6], 0 }
   0x2   :  { %11 = vsyncpa [#allocation9], 0  ;;  %s29_s17 = sshll.u32 %s510_s1, 4  ;;  %s30_s17 = int_to_ptr.hbm [resolvable:$true] %s29_s17 }
   0x3   :  { %12 = vsyncpa [#allocation4], 0  ;;  %s462_s18 = smov [#allocation5]   ;;  %s18_s22 = sshll.u32 %s509_s0, 4  ;;  %s19_s22 = int_to_ptr.hbm [resolvable:$true] %s18_s22 }
   0x4   :  { %s31_s19 = sshll.u32 %s462_s18, 4  ;;  %s463_s23 = smov [#allocation2]   ;;  %s32_s19 = int_to_ptr.vmem [resolvable:$true] %s31_s19 }
   0x5   :  { %34 = dma.hbm_to_vmem [thread:$0]  %s30_s17, 128, %s32_s19, [#allocation6]  }
   0x6   :  { %s20_s24 = sshll.u32 %s463_s23, 4  ;;  %s39_s27 = sshll.u32 %s511_s2, 4  ;;  %s21_s24 = int_to_ptr.vmem [resolvable:$true] %s20_s24  ;;  %s40_s27 = int_to_ptr.hbm [resolvable:$true] %s39_s27 }
   0x7   :  { %23 = dma.hbm_to_vmem [thread:$0]  %s19_s22, 256, %s21_s24, [#allocation3]  }
   0x8   :  { %s464_s1 = smov [#allocation7]   ;;  %s53_s5 = sshll.u32 %s512_s3, 4  ;;  %s54_s5 = int_to_ptr.hbm [resolvable:$true] %s53_s5 }
   0x9   :  { %s41_s28 = sshll.u32 %s464_s1, 4  ;;  %s465_s6 = smov 64   ;;  %s42_s28 = int_to_ptr.vmem [resolvable:$true] %s41_s28 }
   0xa   :  { %s466_s0 = smov 4   ;;  %s467_s7 = smov [#allocation8]  }
   0xb   :  { %47 = dma.hbm_to_vmem [thread:$0]  %s40_s27, 1920, %s42_s28, [#allocation6], %s465_s6, %s465_s6, %s466_s0  }
   0xc   :  { %s55_s8 = sshll.u32 %s467_s7, 4  ;;  %s56_s8 = int_to_ptr.vmem [resolvable:$true] %s55_s8 }
   0xd   :  { %58 = dma.hbm_to_vmem [thread:$0]  %s54_s5, 128, %s56_s8, [#allocation9]  }
   0xe   :  { %454 = dma.done.wait [#allocation3], 256  }
   0xf   :  { %455 = vsyncadd [#allocation3], 4294967040 }
  0x10   :  { %456 = dma.done.wait [#allocation6], 2048  }
  0x11   :  { %457 = vsyncadd [#allocation6], 4294965248 }
  0x12   :  { %458 = dma.done.wait [#allocation9], 128  }
  0x13   :  { %459 = vsyncadd [#allocation9], 4294967168  ;;  %v319_v0 = vld [vmem:[#allocation7 + $0x38] sm:$0xff]   ;;  %v318_v1 = vld [vmem:[#allocation7 + $0x30] sm:$0xff]   ;;  %vm142_vm0 = vcmask 1043456   ;;  %vm166_vm1 = vcmask 195584  }
  0x14   :  { %v288_v2 = vunpack.c.h.bf16 %v319_v0  ;;  %v287_v3 = vunpack.c.l.bf16 %v319_v0  ;;  %v103_v4 = vld [vmem:[#allocation7 + $0x70] sm:$0xf]  ;;  %v325_v5 = vld [vmem:[#allocation7 + $0x68] sm:$0xff]   ;;  %v284_v7 = vunpack.c.h.bf16 %v318_v1  ;;  %v324_v9 = vld [vmem:[#allocation7 + $0x60] sm:$0xff]   ;;  %v283_v14 = vunpack.c.l.bf16 %v318_v1  ;;  %s468_s2 = smov [#allocation10]   ;;  %s242_s11 = sshll.u32 %s513_s4, 4  ;;  %s243_s11 = int_to_ptr.hbm [resolvable:$true] %s242_s11 }
  0x15   :  { %v132_v6 = vunpack.c.l.bf16 %v103_v4  ;;  %v312_v8 = vunpack.c.h.bf16 %v325_v5  ;;  %v321_v10 = vld [vmem:[#allocation7 + $0x48] sm:$0xff]   ;;  %v311_v12 = vunpack.c.l.bf16 %v325_v5  ;;  %v320_v13 = vld [vmem:[#allocation7 + $0x40] sm:$0xff]   ;;  %v308_v16 = vunpack.c.h.bf16 %v324_v9  ;;  %v323_v19 = vld [vmem:[#allocation7 + $0x58] sm:$0xff]   ;;  %s240_s3 = sshll.u32 %s468_s2, 4  ;;  %s241_s3 = int_to_ptr.vmem [resolvable:$true] %s240_s3 }
  0x16   :  { %170 = vmatpush.msra.mxu1 %v288_v2  ;;  %v317_v11 = vld [vmem:[#allocation7 + $0x28] sm:$0xff]   ;;  %v295_v15 = vunpack.c.l.bf16 %v321_v10  ;;  %v292_v17 = vunpack.c.h.bf16 %v320_v13  ;;  %v291_v20 = vunpack.c.l.bf16 %v320_v13  ;;  %v316_v21 = vld [vmem:[#allocation7 + $0x20] sm:$0xff]   ;;  %v307_v22 = vunpack.c.l.bf16 %v324_v9  ;;  %v136_v24 = vld [vmem:[#allocation2 + $0x8] sm:$0xff] }
  0x17   :  { %254 = vmatpush.msk.msra.mxu0 %vm142_vm0, %v132_v6  ;;  %v280_v18 = vunpack.c.h.bf16 %v317_v11  ;;  %v279_v23 = vunpack.c.l.bf16 %v317_v11  ;;  %v304_v25 = vunpack.c.h.bf16 %v323_v19  ;;  %v276_v26 = vunpack.c.h.bf16 %v316_v21  ;;  %v322_v27 = vld [vmem:[#allocation7 + $0x50] sm:$0xff]   ;;  %v315_v28 = vld [vmem:[#allocation7 + $0x18] sm:$0xff]   ;;  %v313_v38 = vld [vmem:[#allocation7 + $0x8] sm:$0xff]  }
  0x18   :  { %171 = vmatpush.msra.mxu1 %v287_v3  ;;  %203 = vmatpush.msra.mxu2 %v295_v15  ;;  %v303_v29 = vunpack.c.l.bf16 %v323_v19  ;;  %v275_v30 = vunpack.c.l.bf16 %v316_v21  ;;  %v300_v31 = vunpack.c.h.bf16 %v322_v27  ;;  %v272_v32 = vunpack.c.h.bf16 %v315_v28  ;;  %v314_v33 = vld [vmem:[#allocation7 + $0x10] sm:$0xff]   ;;  %v137_v39 = vld [vmem:[#allocation5] sm:$0xff]  ;;  %v258_v42 = vld [vmem:[#allocation7] sm:$0xff]  }
  0x19   :  { %153 = vmatpush.msra.mxu0 %v312_v8  ;;  %v299_v34 = vunpack.c.l.bf16 %v322_v27  ;;  %v271_v35 = vunpack.c.l.bf16 %v315_v28  ;;  %v296_v36 = vunpack.c.h.bf16 %v321_v10  ;;  %v268_v37 = vunpack.c.h.bf16 %v314_v33  ;;  %v135_v46 = vld [vmem:[#allocation2] sm:$0xff]  ;;  %v333_v51 = vld [vmem:[#allocation8] ss:$0 sm:$0xff]  ;;  %v134_v55 = vld [vmem:[#allocation8 + $0x1] sm:$0x1] }
  0x1a   :  { %172 = vmatpush.msra.mxu1 %v284_v7  ;;  %204 = vmatpush.msra.mxu2 %v292_v17  ;;  %vm138_vm2 = vcmask 621568   ;;  %v267_v40 = vunpack.c.l.bf16 %v314_v33  ;;  %v264_v41 = vunpack.c.h.bf16 %v313_v38  ;;  %v263_v43 = vunpack.c.l.bf16 %v313_v38 }
  0x1b   :  { %154 = vmatpush.msra.mxu0 %v311_v12  ;;  %v260_v44 = vunpack.c.h.bf16 %v258_v42  ;;  %v259_v45 = vunpack.c.l.bf16 %v258_v42  ;;  %vm233_vm3 = vcmask 57344  }
  0x1c   :  { %173 = vmatpush.msra.mxu1 %v283_v14  ;;  %205 = vmatpush.msra.mxu2 %v291_v20 }
  0x1d   :  { %155 = vmatpush.msra.mxu0 %v308_v16  ;;  %256 = vmatmul.msk.f32.vlgmr.msra.gmra.mxu2 %vm166_vm1, %v136_v24 }
  0x1e   :  { %174 = vmatpush.msra.mxu1 %v280_v18 }
  0x1f   :  { %156 = vmatpush.msra.mxu0 %v307_v22 }
  0x20   :  { %175 = vmatpush.msra.mxu1 %v279_v23 }
  0x21   :  { %157 = vmatpush.msra.mxu0 %v304_v25 }
  0x22   :  { %176 = vmatpush.msra.mxu1 %v276_v26 }
  0x23   :  { %158 = vmatpush.msra.mxu0 %v303_v29 }
  0x24   :  { %177 = vmatpush.msra.mxu1 %v275_v30 }
  0x25   :  { %159 = vmatpush.msra.mxu0 %v300_v31 }
  0x26   :  { %178 = vmatpush.msra.mxu1 %v272_v32 }
  0x27   :  { %160 = vmatpush.msra.mxu0 %v299_v34 }
  0x28   :  { %179 = vmatpush.msra.mxu1 %v271_v35 }
  0x29   :  { %161 = vmatpush.msra.mxu0 %v296_v36 }
  0x2a   :  { %180 = vmatpush.msra.mxu1 %v268_v37  ;;  %255 = vmatmul.msk.f32.vlgmr.msra.gmra.mxu0 %vm138_vm2, %v137_v39 }
  0x2c   :  { %181 = vmatpush.msra.mxu1 %v267_v40 }
  0x2e   :  { %182 = vmatpush.msra.mxu1 %v264_v41 }
  0x30   :  { %183 = vmatpush.msra.mxu1 %v263_v43 }
  0x32   :  { %184 = vmatpush.msra.mxu1 %v260_v44 }
  0x34   :  { %185 = vmatpush.msra.mxu1 %v259_v45 }
  0x35   :  { %186 = vmatmul.f32.vlgmr.msra.gmra.mxu1 %v135_v46 }
  0xa0   :  { %v207_v49 = vpop.f32.mrf.mxu2 }
  0xa7   :  { %v163_v47 = vpop.f32.mrf.mxu0 }
  0xb2   :  { %v187_v48 = vpop.f32.mrf.mxu1 }
  0xb3   :  { %v188_v50 = vadd.f32 %v187_v48, %v163_v47 }
  0xb5   :  { %v208_v52 = vadd.f32 %v207_v49, %v188_v50 }
  0xb7   :  { %v211_v53 = vadd.f32 %v333_v51, %v208_v52 }
  0xb9   :  { %v212_v54 = vmax.f32 %v211_v53, 0.0 }
  0xbb   :  { %228 = vmatpush.xpose.msra.mxu3 %v212_v54 }
  0xbe   :  { %229 = vmatmul.f32.vlgmr.msra.gmra.mxu3 %v134_v55 }
 0x141   :  { %v230_v56 = vpop.f32.mrf.mxu3 }
 0x142   :  { %234 = vst.msk [vmem:[#allocation10] sm:$0x1] %vm233_vm3, %v230_v56 }
 0x143   :  { %245 = dma.vmem_to_hbm [thread:$0]  %s241_s3, 16, %s243_s11, [#allocation4]  }
 0x144   :  { %460 = dma.done.wait [#allocation4], 16  }
 0x145   :  { %461 = vsyncadd [#allocation4], 4294967280 }
 0x146   :  { %250 = vsyncpa [#allocation3], 1 }
 0x147   :  { %251 = vsyncpa [#allocation6], 1 }
 0x148   :  { %252 = vsyncpa [#allocation9], 1 }
 0x149   :  { %253 = vsyncpa [#allocation4], 1 }

</bundles_post_ra>
